<compile_context>
chip_gen: v6e
topology: v6e:2x2x1
jax: 0.10.0
libtpu: 0.0.40
codegen_flags: <defaults>
</compile_context>

<pallas_src>
import functools

import jax
import jax.numpy as jnp
import numpy as np
from jax.experimental import pallas as pl
from jax.experimental.pallas import tpu as pltpu

LANE = 128
SUBLANE = 8


def _ceil_to(x, m):
    return ((x + m - 1) // m) * m


# -------------------------- fused Pallas kernel --------------------------

def _deep_sets_fused_kernel(
    lg_ref,                       # SMEM [2*L] f32 : lamb_0, gamma_0, lamb_1, gamma_1, ...
    x_ref,                        # [Np, F]   node features (pad rows = 0)
    oh_ref,                       # [Np, Bp]  one-hot node->graph (pad rows = 0)
    ohm_ref,                      # [Bp, Np]  mean-pool matrix = onehot^T / count (pad cols/rows = 0)
    w_init_ref, b_init_ref,       # [F, Hp], [1, Hp]
    w_phi0_ref, b_phi0_ref,       # [Hp, Hp], [1, Hp]
    w_phi1_ref, b_phi1_ref,
    w_rho0_ref, b_rho0_ref,
    w_rho1_ref, b_rho1_ref,
    o_ref,                        # [Bp, Hp]  output (sliced to [B, H] outside)
    *, num_layers,
):
    f32 = jnp.float32
    x = x_ref[...]
    oh = oh_ref[...]
    ohm = ohm_ref[...]

    # Hoist all SMEM scalar reads ahead of the compute.
    lambs = [lg_ref[2 * l] for l in range(num_layers)]
    gammas = [lg_ref[2 * l + 1] for l in range(num_layers)]

    # init_mlp
    h = jnp.dot(x, w_init_ref[...], preferred_element_type=f32) + b_init_ref[...]

    # Equivariant layers: ReLU(lamb * h + gamma * mean_pool(h)[batch])
    for l in range(num_layers):
        pooled = jnp.dot(ohm, h, preferred_element_type=f32)                # [Bp, Hp] segment mean
        # Scale gamma on the small pooled tensor, then gather back to nodes via MXU.
        gathered = jnp.dot(oh, gammas[l] * pooled, preferred_element_type=f32)  # [Np, Hp]
        h = jnp.maximum(lambs[l] * h + gathered, 0.0)

    # Invariant layer: rho(pool(phi(h)))
    h = jnp.maximum(
        jnp.dot(h, w_phi0_ref[...], preferred_element_type=f32) + b_phi0_ref[...], 0.0)
    h = jnp.dot(h, w_phi1_ref[...], preferred_element_type=f32) + b_phi1_ref[...]
    # TODO(synk): nn.Dropout is identity in eval mode; no dropout applied here.
    pooled = jnp.dot(ohm, h, preferred_element_type=f32)                    # [Bp, Hp]
    r = jnp.maximum(
        jnp.dot(pooled, w_rho0_ref[...], preferred_element_type=f32) + b_rho0_ref[...], 0.0)
    o_ref[...] = (
        jnp.dot(r, w_rho1_ref[...], preferred_element_type=f32) + b_rho1_ref[...]
    ).astype(o_ref.dtype)


# -------------------------- wrapper --------------------------

def _full_spec(shape):
    ndim = len(shape)
    return pl.BlockSpec(shape, lambda: (0,) * ndim)


def deep_sets_forward(padded_params, lg_flat, x, batch, *, num_graphs, hidden_dim):
    """Runs the fused DeepSets forward.  Returns [num_graphs, hidden_dim]."""
    n, f = x.shape
    hp = padded_params["init_mlp"][0].shape[1]
    num_layers = lg_flat.shape[0] // 2

    bp = _ceil_to(max(num_graphs, 1), SUBLANE)   # sublane-friendly pooled tensor
    npad = _ceil_to(n, SUBLANE)                  # sublane-friendly node axis

    # Host-side layout plumbing (plain JAX, negligible): zero-pad nodes, build the
    # one-hot gather matrix and the pre-scaled mean-pool matrix.  Pad-node rows are
    # all-zero in both, so they never influence pooled values or the output.
    x_p = jnp.zeros((npad, f), jnp.float32).at[:n].set(x.astype(jnp.float32))
    onehot = (batch[:, None] == jnp.arange(bp, dtype=batch.dtype)[None, :]).astype(jnp.float32)
    onehot = jnp.zeros((npad, bp), jnp.float32).at[:n].set(onehot)            # [Np, Bp]
    counts = onehot.sum(axis=0)                                               # [Bp]
    inv_counts = jnp.where(counts > 0, 1.0 / jnp.maximum(counts, 1.0), 0.0)
    oh_mean = onehot.T * inv_counts[:, None]                                  # [Bp, Np]

    weight_args = (
        *padded_params["init_mlp"],
        *padded_params["phi0"], *padded_params["phi1"],
        *padded_params["rho0"], *padded_params["rho1"],
    )
    dense_args = (x_p, onehot, oh_mean) + weight_args

    # Advisory cost estimate: init matmul, per-layer (pool + gather) matmuls, phi (2),
    # final pool, rho (2), plus elementwise ReLU/scale work.
    flops = (
        2 * npad * f * hp
        + num_layers * (4 * npad * bp * hp + 3 * npad * hp + bp * hp)
        + 2 * (2 * npad * hp * hp)
        + 2 * bp * npad * hp
        + 2 * (2 * bp * hp * hp)
    )
    bytes_accessed = (
        sum(int(np.prod(a.shape)) * 4 for a in (lg_flat,) + dense_args) + bp * hp * 4
    )

    out_padded = pl.pallas_call(
        functools.partial(_deep_sets_fused_kernel, num_layers=num_layers),
        out_shape=jax.ShapeDtypeStruct((bp, hp), jnp.float32),
        in_specs=[pl.BlockSpec(memory_space=pltpu.SMEM)]
                 + [_full_spec(a.shape) for a in dense_args],
        out_specs=_full_spec((bp, hp)),
        cost_estimate=pl.CostEstimate(
            flops=int(flops), transcendentals=0, bytes_accessed=int(bytes_accessed)),
    )(lg_flat, *dense_args)

    return out_padded[:num_graphs, :hidden_dim]


# -------------------------- parameters --------------------------

def init_params(key, input_dim, hidden_dim, num_layers):
    """Unpadded params (used by the pure-JAX reference)."""
    def lin(k, fan_in, fan_out):
        k1, k2 = jax.random.split(k)
        bound = 1.0 / np.sqrt(fan_in)
        w = jax.random.uniform(k1, (fan_in, fan_out), jnp.float32, -bound, bound)
        b = jax.random.uniform(k2, (1, fan_out), jnp.float32, -bound, bound)
        return w, b

    keys = jax.random.split(key, 6 + num_layers)
    params = {
        "init_mlp": lin(keys[0], input_dim, hidden_dim),
        # PyTorch init is lamb=1, gamma=0; use non-trivial values here so the
        # pooling/gather path is actually exercised by the correctness check.
        "equiv": [jax.random.uniform(keys[5 + l], (2,), jnp.float32, 0.5, 1.5)
                  for l in range(num_layers)],
        "phi0": lin(keys[1], hidden_dim, hidden_dim),
        "phi1": lin(keys[2], hidden_dim, hidden_dim),
        "rho0": lin(keys[3], hidden_dim, hidden_dim),
        "rho1": lin(keys[4], hidden_dim, hidden_dim),
    }
    return params


def pad_params(params, input_dim, hidden_dim, hidden_pad):
    """Zero-pad weights/biases to lane-dense hidden_pad columns (and rows for H->H)."""
    def padded(wb, rows_to):
        w, b = wb
        wp = jnp.zeros((rows_to, hidden_pad), jnp.float32).at[:w.shape[0], :w.shape[1]].set(w)
        bp = jnp.zeros((1, hidden_pad), jnp.float32).at[:, :b.shape[1]].set(b)
        return wp, bp

    return {
        "init_mlp": padded(params["init_mlp"], input_dim),
        "phi0": padded(params["phi0"], hidden_pad),
        "phi1": padded(params["phi1"], hidden_pad),
        "rho0": padded(params["rho0"], hidden_pad),
        "rho1": padded(params["rho1"], hidden_pad),
    }


# -------------------------- pure-JAX reference --------------------------

def reference_forward(params, x, batch, num_graphs):
    def lin(v, wb):
        return v @ wb[0] + wb[1]

    def seg_mean(v):
        oh = (batch[:, None] == jnp.arange(num_graphs)[None, :]).astype(jnp.float32)
        s = oh.T @ v
        return s / oh.sum(0)[:, None]

    h = lin(x, params["init_mlp"])
    for lg in params["equiv"]:
        pooled = seg_mean(h)
        h = jnp.maximum(lg[0] * h + lg[1] * pooled[batch], 0.0)
    h = jnp.maximum(lin(h, params["phi0"]), 0.0)
    h = lin(h, params["phi1"])
    pooled = seg_mean(h)
    out = jnp.maximum(lin(pooled, params["rho0"]), 0.0)
    return lin(out, params["rho1"])


# -------------------------- main --------------------------

if __name__ == "__main__":
    INPUT_DIM = 8
    HIDDEN_DIM = 32
    NUM_LAYERS = 2
    NUM_GRAPHS = 4
    NODES_PER_GRAPH = 4
    N = NUM_GRAPHS * NODES_PER_GRAPH

    HIDDEN_PAD = _ceil_to(HIDDEN_DIM, LANE)     # 128: lane-dense intermediates & output

    key = jax.random.PRNGKey(0)
    k_x, k_p = jax.random.split(key)

    x = jax.random.normal(k_x, (N, INPUT_DIM), jnp.float32)
    batch = jnp.repeat(jnp.arange(NUM_GRAPHS, dtype=jnp.int32), NODES_PER_GRAPH)

    params = init_params(k_p, INPUT_DIM, HIDDEN_DIM, NUM_LAYERS)
    padded_params = pad_params(params, INPUT_DIM, HIDDEN_DIM, HIDDEN_PAD)
    lg_flat = jnp.stack(params["equiv"]).astype(jnp.float32).reshape(-1)     # [2*L]

    out = deep_sets_forward(padded_params, lg_flat, x, batch,
                            num_graphs=NUM_GRAPHS, hidden_dim=HIDDEN_DIM)
    out = jax.block_until_ready(out)

    ref = reference_forward(params, x, batch, NUM_GRAPHS)
    np.testing.assert_allclose(np.asarray(out), np.asarray(ref), rtol=1e-5, atol=1e-5)

    print("KERNEL_OK")
</pallas_src>

<mosaic_0001>
module attributes {stable_mosaic.version = 11 : i64} {
  func.func @_deep_sets_fused_kernel(%arg0: memref<4xf32, #tpu.memory_space<smem>>, %arg1: memref<16x8xf32, #tpu.memory_space<vmem>>, %arg2: memref<16x8xf32, #tpu.memory_space<vmem>>, %arg3: memref<8x16xf32, #tpu.memory_space<vmem>>, %arg4: memref<8x128xf32, #tpu.memory_space<vmem>>, %arg5: memref<1x128xf32, #tpu.memory_space<vmem>>, %arg6: memref<128x128xf32, #tpu.memory_space<vmem>>, %arg7: memref<1x128xf32, #tpu.memory_space<vmem>>, %arg8: memref<128x128xf32, #tpu.memory_space<vmem>>, %arg9: memref<1x128xf32, #tpu.memory_space<vmem>>, %arg10: memref<128x128xf32, #tpu.memory_space<vmem>>, %arg11: memref<1x128xf32, #tpu.memory_space<vmem>>, %arg12: memref<128x128xf32, #tpu.memory_space<vmem>>, %arg13: memref<1x128xf32, #tpu.memory_space<vmem>>, %arg14: memref<8x128xf32, #tpu.memory_space<vmem>>) attributes {dimension_semantics = [], scalar_prefetch = 0 : i64, scratch_operands = 0 : i64, tpu.core_type = #tpu.core_type<tc>} {
    %c0 = arith.constant 0 : index
    %c0_0 = arith.constant 0 : index
    %0 = vector.load %arg1[%c0, %c0_0] : memref<16x8xf32, #tpu.memory_space<vmem>>, vector<16x8xf32>
    %c0_1 = arith.constant 0 : index
    %c0_2 = arith.constant 0 : index
    %1 = vector.load %arg2[%c0_1, %c0_2] : memref<16x8xf32, #tpu.memory_space<vmem>>, vector<16x8xf32>
    %c0_3 = arith.constant 0 : index
    %c0_4 = arith.constant 0 : index
    %2 = vector.load %arg3[%c0_3, %c0_4] : memref<8x16xf32, #tpu.memory_space<vmem>>, vector<8x16xf32>
    %c0_5 = arith.constant 0 : index
    %3 = memref.load %arg0[%c0_5] : memref<4xf32, #tpu.memory_space<smem>>
    %c2 = arith.constant 2 : index
    %4 = memref.load %arg0[%c2] : memref<4xf32, #tpu.memory_space<smem>>
    %c1 = arith.constant 1 : index
    %5 = memref.load %arg0[%c1] : memref<4xf32, #tpu.memory_space<smem>>
    %c3 = arith.constant 3 : index
    %6 = memref.load %arg0[%c3] : memref<4xf32, #tpu.memory_space<smem>>
    %c0_6 = arith.constant 0 : index
    %c0_7 = arith.constant 0 : index
    %7 = vector.load %arg4[%c0_6, %c0_7] : memref<8x128xf32, #tpu.memory_space<vmem>>, vector<8x128xf32>
    %cst = arith.constant dense<0.000000e+00> : vector<16x128xf32>
    %8 = tpu.matmul %0, %7, %cst {dimension_numbers = #tpu.dot_dimension_numbers<[1], [0], [0], [1], [0, 0, 1, 1], [], []>} : vector<16x8xf32>, vector<8x128xf32>, vector<16x128xf32> -> vector<16x128xf32>
    %c0_8 = arith.constant 0 : index
    %c0_9 = arith.constant 0 : index
    %9 = vector.load %arg5[%c0_8, %c0_9] : memref<1x128xf32, #tpu.memory_space<vmem>>, vector<1x128xf32>
    %10 = vector.broadcast %9 : vector<1x128xf32> to vector<16x128xf32>
    %11 = arith.addf %8, %10 : vector<16x128xf32>
    %cst_10 = arith.constant dense<0.000000e+00> : vector<8x128xf32>
    %12 = tpu.matmul %2, %11, %cst_10 {dimension_numbers = #tpu.dot_dimension_numbers<[1], [0], [0], [1], [0, 0, 1, 1], [], []>} : vector<8x16xf32>, vector<16x128xf32>, vector<8x128xf32> -> vector<8x128xf32>
    %13 = vector.broadcast %5 : f32 to vector<8x128xf32>
    %14 = arith.mulf %13, %12 : vector<8x128xf32>
    %cst_11 = arith.constant dense<0.000000e+00> : vector<16x128xf32>
    %15 = tpu.matmul %1, %14, %cst_11 {dimension_numbers = #tpu.dot_dimension_numbers<[1], [0], [0], [1], [0, 0, 1, 1], [], []>} : vector<16x8xf32>, vector<8x128xf32>, vector<16x128xf32> -> vector<16x128xf32>
    %16 = vector.broadcast %3 : f32 to vector<16x128xf32>
    %17 = arith.mulf %16, %11 : vector<16x128xf32>
    %18 = arith.addf %17, %15 : vector<16x128xf32>
    %cst_12 = arith.constant 0.000000e+00 : f32
    %19 = vector.broadcast %cst_12 : f32 to vector<16x128xf32>
    %20 = arith.maximumf %18, %19 : vector<16x128xf32>
    %cst_13 = arith.constant dense<0.000000e+00> : vector<8x128xf32>
    %21 = tpu.matmul %2, %20, %cst_13 {dimension_numbers = #tpu.dot_dimension_numbers<[1], [0], [0], [1], [0, 0, 1, 1], [], []>} : vector<8x16xf32>, vector<16x128xf32>, vector<8x128xf32> -> vector<8x128xf32>
    %22 = vector.broadcast %6 : f32 to vector<8x128xf32>
    %23 = arith.mulf %22, %21 : vector<8x128xf32>
    %cst_14 = arith.constant dense<0.000000e+00> : vector<16x128xf32>
    %24 = tpu.matmul %1, %23, %cst_14 {dimension_numbers = #tpu.dot_dimension_numbers<[1], [0], [0], [1], [0, 0, 1, 1], [], []>} : vector<16x8xf32>, vector<8x128xf32>, vector<16x128xf32> -> vector<16x128xf32>
    %25 = vector.broadcast %4 : f32 to vector<16x128xf32>
    %26 = arith.mulf %25, %20 : vector<16x128xf32>
    %27 = arith.addf %26, %24 : vector<16x128xf32>
    %cst_15 = arith.constant 0.000000e+00 : f32
    %28 = vector.broadcast %cst_15 : f32 to vector<16x128xf32>
    %29 = arith.maximumf %27, %28 : vector<16x128xf32>
    %c0_16 = arith.constant 0 : index
    %c0_17 = arith.constant 0 : index
    %30 = vector.load %arg6[%c0_16, %c0_17] : memref<128x128xf32, #tpu.memory_space<vmem>>, vector<128x128xf32>
    %cst_18 = arith.constant dense<0.000000e+00> : vector<16x128xf32>
    %31 = tpu.matmul %29, %30, %cst_18 {dimension_numbers = #tpu.dot_dimension_numbers<[1], [0], [0], [1], [0, 0, 1, 1], [], []>} : vector<16x128xf32>, vector<128x128xf32>, vector<16x128xf32> -> vector<16x128xf32>
    %c0_19 = arith.constant 0 : index
    %c0_20 = arith.constant 0 : index
    %32 = vector.load %arg7[%c0_19, %c0_20] : memref<1x128xf32, #tpu.memory_space<vmem>>, vector<1x128xf32>
    %33 = vector.broadcast %32 : vector<1x128xf32> to vector<16x128xf32>
    %34 = arith.addf %31, %33 : vector<16x128xf32>
    %cst_21 = arith.constant 0.000000e+00 : f32
    %35 = vector.broadcast %cst_21 : f32 to vector<16x128xf32>
    %36 = arith.maximumf %34, %35 : vector<16x128xf32>
    %c0_22 = arith.constant 0 : index
    %c0_23 = arith.constant 0 : index
    %37 = vector.load %arg8[%c0_22, %c0_23] : memref<128x128xf32, #tpu.memory_space<vmem>>, vector<128x128xf32>
    %cst_24 = arith.constant dense<0.000000e+00> : vector<16x128xf32>
    %38 = tpu.matmul %36, %37, %cst_24 {dimension_numbers = #tpu.dot_dimension_numbers<[1], [0], [0], [1], [0, 0, 1, 1], [], []>} : vector<16x128xf32>, vector<128x128xf32>, vector<16x128xf32> -> vector<16x128xf32>
    %c0_25 = arith.constant 0 : index
    %c0_26 = arith.constant 0 : index
    %39 = vector.load %arg9[%c0_25, %c0_26] : memref<1x128xf32, #tpu.memory_space<vmem>>, vector<1x128xf32>
    %40 = vector.broadcast %39 : vector<1x128xf32> to vector<16x128xf32>
    %41 = arith.addf %38, %40 : vector<16x128xf32>
    %cst_27 = arith.constant dense<0.000000e+00> : vector<8x128xf32>
    %42 = tpu.matmul %2, %41, %cst_27 {dimension_numbers = #tpu.dot_dimension_numbers<[1], [0], [0], [1], [0, 0, 1, 1], [], []>} : vector<8x16xf32>, vector<16x128xf32>, vector<8x128xf32> -> vector<8x128xf32>
    %c0_28 = arith.constant 0 : index
    %c0_29 = arith.constant 0 : index
    %43 = vector.load %arg10[%c0_28, %c0_29] : memref<128x128xf32, #tpu.memory_space<vmem>>, vector<128x128xf32>
    %cst_30 = arith.constant dense<0.000000e+00> : vector<8x128xf32>
    %44 = tpu.matmul %42, %43, %cst_30 {dimension_numbers = #tpu.dot_dimension_numbers<[1], [0], [0], [1], [0, 0, 1, 1], [], []>} : vector<8x128xf32>, vector<128x128xf32>, vector<8x128xf32> -> vector<8x128xf32>
    %c0_31 = arith.constant 0 : index
    %c0_32 = arith.constant 0 : index
    %45 = vector.load %arg11[%c0_31, %c0_32] : memref<1x128xf32, #tpu.memory_space<vmem>>, vector<1x128xf32>
    %46 = vector.broadcast %45 : vector<1x128xf32> to vector<8x128xf32>
    %47 = arith.addf %44, %46 : vector<8x128xf32>
    %cst_33 = arith.constant 0.000000e+00 : f32
    %48 = vector.broadcast %cst_33 : f32 to vector<8x128xf32>
    %49 = arith.maximumf %47, %48 : vector<8x128xf32>
    %c0_34 = arith.constant 0 : index
    %c0_35 = arith.constant 0 : index
    %50 = vector.load %arg12[%c0_34, %c0_35] : memref<128x128xf32, #tpu.memory_space<vmem>>, vector<128x128xf32>
    %cst_36 = arith.constant dense<0.000000e+00> : vector<8x128xf32>
    %51 = tpu.matmul %49, %50, %cst_36 {dimension_numbers = #tpu.dot_dimension_numbers<[1], [0], [0], [1], [0, 0, 1, 1], [], []>} : vector<8x128xf32>, vector<128x128xf32>, vector<8x128xf32> -> vector<8x128xf32>
    %c0_37 = arith.constant 0 : index
    %c0_38 = arith.constant 0 : index
    %52 = vector.load %arg13[%c0_37, %c0_38] : memref<1x128xf32, #tpu.memory_space<vmem>>, vector<1x128xf32>
    %53 = vector.broadcast %52 : vector<1x128xf32> to vector<8x128xf32>
    %54 = arith.addf %51, %53 : vector<8x128xf32>
    %c0_39 = arith.constant 0 : index
    %c0_40 = arith.constant 0 : index
    %55 = vector.load %arg14[%c0_39, %c0_40] : memref<8x128xf32, #tpu.memory_space<vmem>>, vector<8x128xf32>
    tpu.vector_store %arg14[%c0_39, %c0_40], %54 {strides = array<i32>} : memref<8x128xf32, #tpu.memory_space<vmem>>, vector<8x128xf32>,
    return
  }
}

</mosaic_0001>

<bundles_post_ra>
// kernel: tpu_custom_call.1
= control target key start
LH: loop header
LB: loop body
LE: loop exit
PB: predicated region body
PF: predicated region fallthrough
CT: control target
= control target key end

     0   :  { %19 = vsyncpa [#allocation5], 0  ;;  %s1644_s0 = inlined_call_operand.vmem [shape: f32[4], index: 0, kind: input, shape index: {}]   ;;  %s1645_s1 = inlined_call_operand.vmem [shape: f32[16,8], index: 1, kind: input, shape index: {}]   ;;  %s1646_s2 = inlined_call_operand.vmem [shape: f32[16,8], index: 2, kind: input, shape index: {}]   ;;  %s1647_s3 = inlined_call_operand.vmem [shape: f32[8,16], index: 3, kind: input, shape index: {}]   ;;  %s1648_s4 = inlined_call_operand.vmem [shape: f32[8,128], index: 4, kind: input, shape index: {}]   ;;  %s1649_s5 = inlined_call_operand.vmem [shape: f32[1,128], index: 5, kind: input, shape index: {}]   ;;  %s1650_s6 = inlined_call_operand.hbm [shape: f32[128,128], index: 6, kind: input, shape index: {}]   ;;  %s1651_s7 = inlined_call_operand.vmem [shape: f32[1,128], index: 7, kind: input, shape index: {}]   ;;  %s1652_s8 = inlined_call_operand.hbm [shape: f32[128,128], index: 8, kind: input, shape index: {}]   ;;  %s1653_s9 = inlined_call_operand.vmem [shape: f32[1,128], index: 9, kind: input, shape index: {}]   ;;  %s1654_s10 = inlined_call_operand.hbm [shape: f32[128,128], index: 10, kind: input, shape index: {}]   ;;  %s1655_s11 = inlined_call_operand.vmem [shape: f32[1,128], index: 11, kind: input, shape index: {}]   ;;  %s1656_s12 = inlined_call_operand.hbm [shape: f32[128,128], index: 12, kind: input, shape index: {}]   ;;  %s1657_s13 = inlined_call_operand.vmem [shape: f32[1,128], index: 13, kind: input, shape index: {}]   ;;  %s1658_s14 = inlined_call_operand.hbm [shape: f32[8,128], index: 14, kind: output, shape index: {}]  }
   0x1   :  { %20 = vsyncpa [#allocation3], 0 }
   0x2   :  { %21 = vsyncpa [#allocation8], 0 }
   0x3   :  { %22 = vsyncpa [#allocation11], 0 }
   0x4   :  { %23 = vsyncpa [#allocation4], 0  ;;  %s30_s15 = sshll.u32 %s1644_s0, 4  ;;  %s1420_s16 = smov [#allocation7]   ;;  %s31_s15 = int_to_ptr.vmem [resolvable:$true] %s30_s15 }
   0x5   :  { %s63_s17 = sshll.u32 %s1420_s16, 4  ;;  %s64_s17 = int_to_ptr.vmem [resolvable:$true] %s63_s17 }
   0x6   :  { %s1306_s18 = scalar_lea.vmem %s64_s17, 2048  ;;  %p1311_p1 = scmp.lt.s32.totalorder %s64_s17, %s64_s17 }
   0x7   :  { %p1307_p0 = scmp.ne.s32.totalorder %s64_s17, %s1306_s18  ;;  %p1312_p2 = scmp.lt.s32.totalorder %s1306_s18, %s1306_s18 }
   0x9   :  { %p1313_p3 = por %p1312_p2, %p1311_p1 }
   0xb   :  { %p1314_p4 = pnand %p1313_p3, %p1307_p0 }
   0xd   :  { %1317 = shalt.err (!%p1314_p4)
}
   0xe   :  { %s1421_s19 = smov 128   ;;  %s1422_s20 = smov 8  }
   0xf   :  { %69 = dma.hbm_to_vmem [thread:$0]  %s1652_s8, 2048, %s64_s17, [#allocation8], %s1421_s19, %s1421_s19, %s1422_s20  }
  0x10   :  { %s1318_s0 = scalar_lea.vmem %s31_s15, 16  ;;  %p1323_p6 = scmp.lt.s32.totalorder %s31_s15, %s31_s15 }
  0x11   :  { %p1319_p5 = scmp.ne.s32.totalorder %s31_s15, %s1318_s0  ;;  %p1324_p7 = scmp.lt.s32.totalorder %s1318_s0, %s1318_s0 }
  0x13   :  { %p1325_p8 = por %p1324_p7, %p1323_p6 }
  0x15   :  { %p1326_p9 = pnand %p1325_p8, %p1319_p5 }
  0x17   :  { %1329 = shalt.err (!%p1326_p9)
}
  0x18   :  { %s1423_s23 = smov [#allocation2]   ;;  %s1424_s24 = smov [#allocation6]  }
  0x19   :  { %33 = dma.vmem_to_smem %s31_s15, 16, %s1423_s23, [#allocation5]  }
  0x1a   :  { %s49_s25 = sshll.u32 %s1424_s24, 4  ;;  %s1425_s26 = smov [#allocation9]   ;;  %s50_s25 = int_to_ptr.vmem [resolvable:$true] %s49_s25 }
  0x1b   :  { %s77_s27 = sshll.u32 %s1425_s26, 4  ;;  %s1338_s28 = scalar_lea.vmem %s50_s25, 2048  ;;  %s78_s27 = int_to_ptr.vmem [resolvable:$true] %s77_s27 }
  0x1c   :  { %p1339_p10 = scmp.ne.s32.totalorder %s50_s25, %s1338_s28  ;;  %p1343_p11 = scmp.lt.s32.totalorder %s50_s25, %s50_s25 }
  0x1d   :  { %p1344_p12 = scmp.lt.s32.totalorder %s1338_s28, %s1338_s28 }
  0x1f   :  { %p1345_p13 = por %p1344_p12, %p1343_p11 }
  0x21   :  { %p1346_p0 = pnand %p1345_p13, %p1339_p10 }
  0x23   :  { %1349 = shalt.err (!%p1346_p0)
}
  0x24   :  { %55 = dma.hbm_to_vmem [thread:$0]  %s1650_s6, 2048, %s50_s25, [#allocation3], %s1421_s19, %s1421_s19, %s1422_s20  }
  0x25   :  { %s1358_s30 = scalar_lea.vmem %s78_s27, 2048  ;;  %p1363_p2 = scmp.lt.s32.totalorder %s78_s27, %s78_s27 }
  0x26   :  { %p1359_p1 = scmp.ne.s32.totalorder %s78_s27, %s1358_s30  ;;  %p1364_p3 = scmp.lt.s32.totalorder %s1358_s30, %s1358_s30 }
  0x28   :  { %p1365_p4 = por %p1364_p3, %p1363_p2 }
  0x2a   :  { %p1366_p5 = pnand %p1365_p4, %p1359_p1 }
  0x2c   :  { %1369 = shalt.err (!%p1366_p5)
}
  0x2d   :  { %83 = dma.hbm_to_vmem [thread:$0]  %s1654_s10, 2048, %s78_s27, [#allocation8], %s1421_s19, %s1421_s19, %s1422_s20  }
  0x2e   :  { %s1426_s17 = smov [#allocation10]  }
  0x2f   :  { %s91_s18 = sshll.u32 %s1426_s17, 4  ;;  %s92_s18 = int_to_ptr.vmem [resolvable:$true] %s91_s18 }
  0x30   :  { %s1378_s21 = scalar_lea.vmem %s92_s18, 2048  ;;  %p1383_p7 = scmp.lt.s32.totalorder %s92_s18, %s92_s18 }
  0x31   :  { %p1379_p6 = scmp.ne.s32.totalorder %s92_s18, %s1378_s21  ;;  %p1384_p8 = scmp.lt.s32.totalorder %s1378_s21, %s1378_s21 }
  0x33   :  { %p1385_p9 = por %p1384_p8, %p1383_p7 }
  0x35   :  { %p1386_p10 = pnand %p1385_p9, %p1379_p6 }
  0x37   :  { %1389 = shalt.err (!%p1386_p10)
}
  0x38   :  { %97 = dma.hbm_to_vmem [thread:$0]  %s1656_s12, 2048, %s92_s18, [#allocation11], %s1421_s19, %s1421_s19, %s1422_s20  }
  0x39   :  { %1410 = dma.done.wait [#allocation5], 16  }
  0x3a   :  { %1411 = vsyncadd [#allocation5], 4294967280 }
  0x3b   :  { %1412 = dma.done.wait [#allocation3], 2048  }
  0x3c   :  { %1413 = vsyncadd [#allocation3], 4294965248 }
  0x3d   :  { %1414 = dma.done.wait [#allocation8], 4096  }
  0x3e   :  { %1415 = vsyncadd [#allocation8], 4294963200 }
  0x3f   :  { %1416 = dma.done.wait [#allocation11], 2048  }
  0x40   :  { %1417 = vsyncadd [#allocation11], 4294965248 }
  0x41   :  { %115 = sfence }
  0x42   :  { %v125_v0 = vld [vmem:[%s1648_s4] sm:$0xff]  ;;  %vm133_vm0 = vcmask 64512   ;;  %v117_v2 = vld [vmem:[%s1645_s1 + $0x8] sm:$0xff]  ;;  %v1427_v3 = vmov 0.0   ;;  %vm1428_vm1 = vmmov 0   ;;  %vm215_vm2 = vcmask 130048  }
  0x43   :  { %v116_v1 = vld [vmem:[%s1645_s1] sm:$0xff]  ;;  %1112 = vmatprep.subr.mxu0 %v125_v0  ;;  %1117 = vmatprep.subr.mxu1 %v1427_v3  ;;  %v119_v15 = vld [vmem:[%s1646_s2 + $0x8] sm:$0xff]  ;;  %s121_s8 = sld [smem:[#allocation2]]  ;;  %v548_v25 = vld [vmem:[#allocation6 + $0x78] sm:$0xff]  ;;  %s1429_s6 = smov [#allocation12]  }
  0x44   :  { %1114 = vmatprep.mubr.msk.f32.mxu0 %vm133_vm0, %v116_v1  ;;  %1113 = vmatpush3.msra.mxu0 %v125_v0  ;;  %v1010_v4 = vld [vmem:[%s1649_s5] ss:$0 sm:$0xff]  ;;  %v547_v26 = vld [vmem:[#allocation6 + $0x70] sm:$0xff]  ;;  %v546_v27 = vld [vmem:[#allocation6 + $0x68] sm:$0xff]  ;;  %s1007_s29 = sld [smem:[#allocation2 + $0x2]]  ;;  %s995_s22 = sshll.u32 %s1429_s6, 4  ;;  %s996_s22 = int_to_ptr.vmem [resolvable:$true] %s995_s22 }
  0x45   :  { %1115 = vmatmul.mubr.msk.f32.vlgmr.msra.gmra.mxu0 %vm133_vm0, %v117_v2  ;;  %1121 = vmatprep.mubr.msk.f32.mxu1 %vm1428_vm1, %v1427_v3  ;;  %v1552_v9 = vld [vmem:[%s1647_s3] sm:$0xff]  ;;  %s1008_s3 = sld [smem:[#allocation2 + $0x1]]  ;;  %v544_v29 = vld [vmem:[#allocation6 + $0x58] sm:$0xff]  ;;  %v543_v30 = vld [vmem:[#allocation6 + $0x50] sm:$0xff]  ;;  %s1390_s10 = scalar_lea.vmem %s996_s22, 128 }
  0x46   :  { %v118_v10 = vld [vmem:[%s1646_s2] sm:$0xff]  ;;  %v542_v31 = vld [vmem:[#allocation6 + $0x48] sm:$0xff]  ;;  %v540_v33 = vld [vmem:[#allocation6 + $0x38] sm:$0xff]  ;;  %s1009_s2 = sld [smem:[#allocation2 + $0x3]]  ;;  %p1391_p11 = scmp.ne.s32.totalorder %s996_s22, %s1390_s10 }
  0x47   :  { %1126 = vmatprep.mubr.msk.f32.mxu0 %vm133_vm0, %v118_v10  ;;  %v545_v28 = vld [vmem:[#allocation6 + $0x60] sm:$0xff]  ;;  %v539_v34 = vld [vmem:[#allocation6 + $0x30] sm:$0xff]  ;;  %v538_v35 = vld [vmem:[#allocation6 + $0x28] sm:$0xff]  ;;  %p1395_p12 = scmp.lt.s32.totalorder %s996_s22, %s996_s22  ;;  %p1396_p13 = scmp.lt.s32.totalorder %s1390_s10, %s1390_s10 }
  0x48   :  { %v541_v32 = vld [vmem:[#allocation6 + $0x40] sm:$0xff]  ;;  %v536_v41 = vld [vmem:[#allocation6 + $0x18] sm:$0xff]  ;;  %v535_v42 = vld [vmem:[#allocation6 + $0x10] sm:$0xff] }
  0x49   :  { %v372_v16 = vstv %s121_s8  ;;  %v537_v36 = vld [vmem:[#allocation6 + $0x20] sm:$0xff]  ;;  %v534_v43 = vld [vmem:[#allocation6 + $0x8] sm:$0xff]  ;;  %v648_v45 = vld [vmem:[#allocation7 + $0x78] sm:$0xff]  ;;  %p1397_p0 = por %p1396_p13, %p1395_p12 }
  0x4a   :  { %v533_v44 = vld [vmem:[#allocation6] sm:$0xff]  ;;  %v647_v46 = vld [vmem:[#allocation7 + $0x70] sm:$0xff]  ;;  %v646_v47 = vld [vmem:[#allocation7 + $0x68] sm:$0xff]  ;;  %v526_v57 = vstv %s1007_s29 }
  0x4b   :  { %v289_v11 = vstv %s1008_s3  ;;  %v645_v48 = vld [vmem:[#allocation7 + $0x60] sm:$0xff]  ;;  %v644_v49 = vld [vmem:[#allocation7 + $0x58] sm:$0xff]  ;;  %v643_v50 = vld [vmem:[#allocation7 + $0x50] sm:$0xff]  ;;  %p1398_p1 = pnand %p1397_p0, %p1391_p11 }
  0x4c   :  { %v449_v37 = vstv %s1009_s2  ;;  %v642_v51 = vld [vmem:[#allocation7 + $0x48] sm:$0xff]  ;;  %v641_v52 = vld [vmem:[#allocation7 + $0x40] sm:$0xff]  ;;  %v640_v53 = vld [vmem:[#allocation7 + $0x38] sm:$0xff] }
  0x4d   :  { %v639_v54 = vld [vmem:[#allocation7 + $0x30] sm:$0xff]  ;;  %v638_v55 = vld [vmem:[#allocation7 + $0x28] sm:$0xff]  ;;  %v637_v56 = vld [vmem:[#allocation7 + $0x20] sm:$0xff] }
  0x4e   :  { %v636_v2 = vld [vmem:[#allocation7 + $0x18] sm:$0xff] }
 0x105   :  { %v1116_v5 = vpop.f32.mrf.mxu0 }
 0x106   :  { %v212_v6 = vadd.f32 %v1116_v5, %v1010_v4  ;;  %v634_v5 = vld [vmem:[#allocation7 + $0x8] sm:$0xff] }
 0x107   :  { %v206_v7 = vpop.f32.mrf.mxu0 }
 0x108   :  { %v207_v8 = vadd.f32 %v1010_v4, %v206_v7  ;;  %1118 = vmatpush3.msra.mxu1 %v212_v6  ;;  %v374_v17 = vmul.f32 %v372_v16, %v212_v6  ;;  %v635_v4 = vld [vmem:[#allocation7 + $0x10] sm:$0xff]  ;;  %v633_v6 = vld [vmem:[#allocation7] sm:$0xff] }
 0x109   :  { %1119 = vmatprep.subr.mxu1 %v1427_v3  ;;  %v1019_v7 = vld [vmem:[%s1651_s7] ss:$0 sm:$0xff] }
 0x10a   :  { %1120 = vmatpush3.msra.mxu1 %v207_v8  ;;  %v373_v20 = vmul.f32 %v372_v16, %v207_v8  ;;  %v815_v16 = vld [vmem:[#allocation9 + $0x70] sm:$0xff] }
 0x10b   :  { %1122 = vmatmul.mubr.msk.f32.vlgmr.msra.gmra.mxu1 %vm215_vm2, %v1552_v9  ;;  %1129 = vmatprep.subr.mxu1 %v1427_v3 }
 0x10c   :  { %1133 = vmatprep.mubr.msk.f32.mxu1 %vm1428_vm1, %v1427_v3 }
 0x1cb   :  { %v285_v12 = vpop.f32.mrf.mxu1 }
 0x1cc   :  { %v290_v13 = vmul.f32 %v289_v11, %v285_v12 }
 0x1cd   :  { %v1123_v14 = vpop.f32.mrf.mxu1 }
 0x1ce   :  { %1124 = vmatprep.subr.mxu0 %v290_v13 }
 0x1cf   :  { %1125 = vmatpush3.msra.mxu0 %v290_v13 }
 0x1d0   :  { %1127 = vmatmul.mubr.msk.f32.vlgmr.msra.gmra.mxu0 %vm133_vm0, %v119_v15 }
 0x1d1   :  { %1138 = vmatprep.mubr.msk.f32.mxu0 %vm133_vm0, %v118_v10 }
 0x290   :  { %v1128_v18 = vpop.f32.mrf.mxu0 }
 0x291   :  { %v1569_v19 = vadd.f32 %v1128_v18, %v374_v17  ;;  %v814_v17 = vld [vmem:[#allocation9 + $0x68] sm:$0xff]  ;;  %v813_v18 = vld [vmem:[#allocation9 + $0x60] sm:$0xff] }
 0x292   :  { %v363_v21 = vpop.f32.mrf.mxu0 }
 0x293   :  { %v378_v22 = vmax.f32 %v1569_v19, 0.0  ;;  %v1572_v23 = vadd.f32 %v373_v20, %v363_v21  ;;  %v812_v19 = vld [vmem:[#allocation9 + $0x58] sm:$0xff]  ;;  %v811_v20 = vld [vmem:[#allocation9 + $0x50] sm:$0xff]  ;;  %v810_v21 = vld [vmem:[#allocation9 + $0x48] sm:$0xff] }
 0x295   :  { %v377_v24 = vmax.f32 %v1572_v23, 0.0  ;;  %1130 = vmatpush3.msra.mxu1 %v378_v22  ;;  %v528_v59 = vmul.f32 %v526_v57, %v378_v22  ;;  %v809_v22 = vld [vmem:[#allocation9 + $0x40] sm:$0xff]  ;;  %v808_v23 = vld [vmem:[#allocation9 + $0x38] sm:$0xff] }
 0x296   :  { %1131 = vmatprep.subr.mxu1 %v1427_v3 }
 0x297   :  { %1132 = vmatpush3.msra.mxu1 %v377_v24  ;;  %v527_v60 = vmul.f32 %v526_v57, %v377_v24  ;;  %v807_v24 = vld [vmem:[#allocation9 + $0x30] sm:$0xff] }
 0x298   :  { %1134 = vmatmul.mubr.msk.f32.vlgmr.msra.gmra.mxu1 %vm215_vm2, %v1552_v9  ;;  %1141 = vmatprep.subr.mxu1 %v548_v25 }
 0x299   :  { %1142 = vmatpush3.msra.mxu1 %v548_v25  ;;  %v806_v25 = vld [vmem:[#allocation9 + $0x28] sm:$0xff] }
 0x29a   :  { %1143 = vmatprep.subr.mxu1 %v547_v26 }
 0x29b   :  { %1144 = vmatpush3.msra.mxu1 %v547_v26  ;;  %v805_v26 = vld [vmem:[#allocation9 + $0x20] sm:$0xff] }
 0x29c   :  { %1145 = vmatprep.subr.mxu1 %v546_v27 }
 0x29d   :  { %1146 = vmatpush3.msra.mxu1 %v546_v27  ;;  %v804_v27 = vld [vmem:[#allocation9 + $0x18] sm:$0xff] }
 0x29e   :  { %1147 = vmatprep.subr.mxu1 %v545_v28 }
 0x29f   :  { %1148 = vmatpush3.msra.mxu1 %v545_v28  ;;  %v803_v28 = vld [vmem:[#allocation9 + $0x10] sm:$0xff] }
 0x2a0   :  { %1149 = vmatprep.subr.mxu1 %v544_v29 }
 0x2a1   :  { %1150 = vmatpush3.msra.mxu1 %v544_v29  ;;  %v802_v29 = vld [vmem:[#allocation9 + $0x8] sm:$0xff] }
 0x2a2   :  { %1151 = vmatprep.subr.mxu1 %v543_v30 }
 0x2a3   :  { %1152 = vmatpush3.msra.mxu1 %v543_v30  ;;  %v1020_v30 = vld [vmem:[%s1653_s9] ss:$0 sm:$0xff] }
 0x2a4   :  { %1153 = vmatprep.subr.mxu1 %v542_v31 }
 0x2a5   :  { %1154 = vmatpush3.msra.mxu1 %v542_v31 }
 0x2a6   :  { %1155 = vmatprep.subr.mxu1 %v541_v32 }
 0x2a7   :  { %1156 = vmatpush3.msra.mxu1 %v541_v32 }
 0x2a8   :  { %1157 = vmatprep.subr.mxu1 %v540_v33 }
 0x2a9   :  { %1158 = vmatpush3.msra.mxu1 %v540_v33 }
 0x2aa   :  { %1159 = vmatprep.subr.mxu1 %v539_v34 }
 0x2ab   :  { %1160 = vmatpush3.msra.mxu1 %v539_v34 }
 0x2ac   :  { %1161 = vmatprep.subr.mxu1 %v538_v35 }
 0x2ad   :  { %1162 = vmatpush3.msra.mxu1 %v538_v35  ;;  %v801_v35 = vld [vmem:[#allocation9] sm:$0xff] }
 0x2ae   :  { %1163 = vmatprep.subr.mxu1 %v537_v36 }
 0x2af   :  { %1164 = vmatpush3.msra.mxu1 %v537_v36  ;;  %v910_v36 = vld [vmem:[#allocation10 + $0x78] sm:$0xff] }
 0x2b0   :  { %1165 = vmatprep.subr.mxu1 %v536_v41 }
 0x2b1   :  { %1166 = vmatpush3.msra.mxu1 %v536_v41  ;;  %v904_v41 = vld [vmem:[#allocation10 + $0x48] sm:$0xff] }
 0x2b2   :  { %1167 = vmatprep.subr.mxu1 %v535_v42 }
 0x2b3   :  { %1168 = vmatpush3.msra.mxu1 %v535_v42  ;;  %v903_v42 = vld [vmem:[#allocation10 + $0x40] sm:$0xff] }
 0x2b4   :  { %1169 = vmatprep.subr.mxu1 %v534_v43 }
 0x2b5   :  { %1170 = vmatpush3.msra.mxu1 %v534_v43  ;;  %v902_v43 = vld [vmem:[#allocation10 + $0x38] sm:$0xff] }
 0x2b6   :  { %1171 = vmatprep.subr.mxu1 %v533_v44 }
 0x2b7   :  { %1172 = vmatpush3.msra.mxu1 %v533_v44  ;;  %v901_v44 = vld [vmem:[#allocation10 + $0x30] sm:$0xff] }
 0x2b8   :  { %1211 = vmatprep.subr.mxu1 %v1427_v3 }
 0x358   :  { %v445_v38 = vpop.f32.mrf.mxu1 }
 0x359   :  { %v450_v39 = vmul.f32 %v449_v37, %v445_v38  ;;  %v909_v37 = vld [vmem:[#allocation10 + $0x70] sm:$0xff]  ;;  %v908_v38 = vld [vmem:[#allocation10 + $0x68] sm:$0xff] }
 0x35a   :  { %v1135_v40 = vpop.f32.mrf.mxu1 }
 0x35b   :  { %1136 = vmatprep.subr.mxu0 %v450_v39  ;;  %v905_v40 = vld [vmem:[#allocation10 + $0x50] sm:$0xff] }
 0x35c   :  { %1137 = vmatpush3.msra.mxu0 %v450_v39  ;;  %v907_v39 = vld [vmem:[#allocation10 + $0x60] sm:$0xff] }
 0x35d   :  { %1139 = vmatmul.mubr.msk.f32.vlgmr.msra.gmra.mxu0 %vm133_vm0, %v119_v15  ;;  %1176 = vmatprep.subr.mxu0 %v648_v45  ;;  %v816_v15 = vld [vmem:[#allocation9 + $0x78] sm:$0xff] }
 0x35e   :  { %1177 = vmatpush3.msra.mxu0 %v648_v45  ;;  %v900_v45 = vld [vmem:[#allocation10 + $0x28] sm:$0xff] }
 0x35f   :  { %1178 = vmatprep.subr.mxu0 %v647_v46 }
 0x360   :  { %1179 = vmatpush3.msra.mxu0 %v647_v46  ;;  %v899_v46 = vld [vmem:[#allocation10 + $0x20] sm:$0xff] }
 0x361   :  { %1180 = vmatprep.subr.mxu0 %v646_v47 }
 0x362   :  { %1181 = vmatpush3.msra.mxu0 %v646_v47  ;;  %v898_v47 = vld [vmem:[#allocation10 + $0x18] sm:$0xff] }
 0x363   :  { %1182 = vmatprep.subr.mxu0 %v645_v48 }
 0x364   :  { %1183 = vmatpush3.msra.mxu0 %v645_v48 }
 0x365   :  { %1184 = vmatprep.subr.mxu0 %v644_v49 }
 0x366   :  { %1185 = vmatpush3.msra.mxu0 %v644_v49 }
 0x367   :  { %1186 = vmatprep.subr.mxu0 %v643_v50 }
 0x368   :  { %1187 = vmatpush3.msra.mxu0 %v643_v50  ;;  %v897_v50 = vld [vmem:[#allocation10 + $0x10] sm:$0xff] }
 0x369   :  { %1188 = vmatprep.subr.mxu0 %v642_v51 }
 0x36a   :  { %1189 = vmatpush3.msra.mxu0 %v642_v51  ;;  %v896_v51 = vld [vmem:[#allocation10 + $0x8] sm:$0xff] }
 0x36b   :  { %1190 = vmatprep.subr.mxu0 %v641_v52 }
 0x36c   :  { %1191 = vmatpush3.msra.mxu0 %v641_v52  ;;  %v895_v52 = vld [vmem:[#allocation10] sm:$0xff] }
 0x36d   :  { %1192 = vmatprep.subr.mxu0 %v640_v53 }
 0x36e   :  { %1193 = vmatpush3.msra.mxu0 %v640_v53  ;;  %v1022_v53 = vld [vmem:[%s1655_s11] ss:$0 sm:$0xff] }
 0x36f   :  { %1194 = vmatprep.subr.mxu0 %v639_v54 }
 0x370   :  { %1195 = vmatpush3.msra.mxu0 %v639_v54 }
 0x371   :  { %1196 = vmatprep.subr.mxu0 %v638_v55 }
 0x372   :  { %1197 = vmatpush3.msra.mxu0 %v638_v55 }
 0x373   :  { %1198 = vmatprep.subr.mxu0 %v637_v56 }
 0x374   :  { %1199 = vmatpush3.msra.mxu0 %v637_v56 }
 0x375   :  { %1200 = vmatprep.subr.mxu0 %v636_v2 }
 0x376   :  { %1201 = vmatpush3.msra.mxu0 %v636_v2 }
 0x377   :  { %1202 = vmatprep.subr.mxu0 %v635_v4 }
 0x378   :  { %1203 = vmatpush3.msra.mxu0 %v635_v4 }
 0x379   :  { %1204 = vmatprep.subr.mxu0 %v634_v5 }
 0x37a   :  { %1205 = vmatpush3.msra.mxu0 %v634_v5 }
 0x37b   :  { %1206 = vmatprep.subr.mxu0 %v633_v6 }
 0x37c   :  { %1207 = vmatpush3.msra.mxu0 %v633_v6 }
 0x37d   :  { %1218 = vmatprep.subr.mxu0 %v1427_v3 }
 0x41d   :  { %v1140_v58 = vpop.f32.mrf.mxu0 }
 0x41e   :  { %v530_v61 = vadd.f32 %v1140_v58, %v528_v59  ;;  %v1023_v58 = vld [vmem:[%s1657_s13] ss:$0 sm:$0xff] }
 0x41f   :  { %v517_v62 = vpop.f32.mrf.mxu0 }
 0x420   :  { %v529_v63 = vadd.f32 %v527_v60, %v517_v62  ;;  %v532_v1 = vmax.f32 %v530_v61, 0.0 }
 0x422   :  { %v531_v0 = vmax.f32 %v529_v63, 0.0 }
 0x424   :  { %1173 = vmatprep.mubr.f32.mxu1 %v531_v0 }
 0x425   :  { %1174 = vmatmul.mubr.f32.vlgmr.msra.gmra.mxu1 %v532_v1 }
 0x426   :  { %1215 = vmatprep.mubr.msk.f32.mxu1 %vm1428_vm1, %v1427_v3 }
 0x4e5   :  { %v1175_v8 = vpop.f32.mrf.mxu1 }
 0x4e6   :  { %v628_v10 = vadd.f32 %v1175_v8, %v1019_v7 }
 0x4e7   :  { %v622_v11 = vpop.f32.mrf.mxu1 }
 0x4e8   :  { %v623_v12 = vadd.f32 %v1019_v7, %v622_v11  ;;  %v632_v14 = vmax.f32 %v628_v10, 0.0 }
 0x4ea   :  { %v631_v13 = vmax.f32 %v623_v12, 0.0 }
 0x4ec   :  { %1208 = vmatprep.mubr.f32.mxu0 %v631_v13 }
 0x4ed   :  { %1209 = vmatmul.mubr.f32.vlgmr.msra.gmra.mxu0 %v632_v14 }
 0x4ee   :  { %1250 = vmatprep.mubr.msk.f32.mxu0 %vm1428_vm1, %v1427_v3  ;;  %1219 = vmatpush3.msra.mxu0 %v816_v15 }
 0x4ef   :  { %1220 = vmatprep.subr.mxu0 %v1427_v3 }
 0x4f0   :  { %1221 = vmatpush3.msra.mxu0 %v815_v16 }
 0x4f1   :  { %1222 = vmatprep.subr.mxu0 %v1427_v3 }
 0x4f2   :  { %1223 = vmatpush3.msra.mxu0 %v814_v17 }
 0x4f3   :  { %1224 = vmatprep.subr.mxu0 %v1427_v3 }
 0x4f4   :  { %1225 = vmatpush3.msra.mxu0 %v813_v18 }
 0x4f5   :  { %1226 = vmatprep.subr.mxu0 %v1427_v3 }
 0x4f6   :  { %1227 = vmatpush3.msra.mxu0 %v812_v19 }
 0x4f7   :  { %1228 = vmatprep.subr.mxu0 %v1427_v3 }
 0x4f8   :  { %1229 = vmatpush3.msra.mxu0 %v811_v20 }
 0x4f9   :  { %1230 = vmatprep.subr.mxu0 %v1427_v3 }
 0x4fa   :  { %1231 = vmatpush3.msra.mxu0 %v810_v21 }
 0x4fb   :  { %1232 = vmatprep.subr.mxu0 %v1427_v3 }
 0x4fc   :  { %1233 = vmatpush3.msra.mxu0 %v809_v22 }
 0x4fd   :  { %1234 = vmatprep.subr.mxu0 %v1427_v3 }
 0x4fe   :  { %1235 = vmatpush3.msra.mxu0 %v808_v23 }
 0x4ff   :  { %1236 = vmatprep.subr.mxu0 %v1427_v3 }
 0x500   :  { %1237 = vmatpush3.msra.mxu0 %v807_v24 }
 0x501   :  { %1238 = vmatprep.subr.mxu0 %v1427_v3 }
 0x502   :  { %1239 = vmatpush3.msra.mxu0 %v806_v25 }
 0x503   :  { %1240 = vmatprep.subr.mxu0 %v1427_v3 }
 0x504   :  { %1241 = vmatpush3.msra.mxu0 %v805_v26 }
 0x505   :  { %1242 = vmatprep.subr.mxu0 %v1427_v3 }
 0x506   :  { %1243 = vmatpush3.msra.mxu0 %v804_v27 }
 0x507   :  { %1244 = vmatprep.subr.mxu0 %v1427_v3 }
 0x508   :  { %1245 = vmatpush3.msra.mxu0 %v803_v28 }
 0x509   :  { %1246 = vmatprep.subr.mxu0 %v1427_v3 }
 0x50a   :  { %1247 = vmatpush3.msra.mxu0 %v802_v29 }
 0x50b   :  { %1248 = vmatprep.subr.mxu0 %v1427_v3 }
 0x50c   :  { %1249 = vmatpush3.msra.mxu0 %v801_v35 }
 0x5ad   :  { %v1210_v31 = vpop.f32.mrf.mxu0 }
 0x5ae   :  { %v728_v32 = vadd.f32 %v1210_v31, %v1020_v30 }
 0x5af   :  { %v722_v33 = vpop.f32.mrf.mxu0 }
 0x5b0   :  { %v723_v34 = vadd.f32 %v1020_v30, %v722_v33  ;;  %1212 = vmatpush3.msra.mxu1 %v728_v32 }
 0x5b1   :  { %1213 = vmatprep.subr.mxu1 %v1427_v3 }
 0x5b2   :  { %1214 = vmatpush3.msra.mxu1 %v723_v34 }
 0x5b3   :  { %1216 = vmatmul.mubr.msk.f32.vlgmr.msra.gmra.mxu1 %vm215_vm2, %v1552_v9  ;;  %1253 = vmatprep.subr.mxu1 %v1427_v3  ;;  %v906_v9 = vld [vmem:[#allocation10 + $0x58] sm:$0xff] }
 0x5b4   :  { %1285 = vmatprep.mubr.msk.f32.mxu1 %vm1428_vm1, %v1427_v3  ;;  %1254 = vmatpush3.msra.mxu1 %v910_v36 }
 0x5b5   :  { %1255 = vmatprep.subr.mxu1 %v1427_v3 }
 0x5b6   :  { %1256 = vmatpush3.msra.mxu1 %v909_v37 }
 0x5b7   :  { %1257 = vmatprep.subr.mxu1 %v1427_v3 }
 0x5b8   :  { %1258 = vmatpush3.msra.mxu1 %v908_v38 }
 0x5b9   :  { %1259 = vmatprep.subr.mxu1 %v1427_v3 }
 0x5ba   :  { %1260 = vmatpush3.msra.mxu1 %v907_v39 }
 0x5bb   :  { %1261 = vmatprep.subr.mxu1 %v1427_v3 }
 0x5bc   :  { %1262 = vmatpush3.msra.mxu1 %v906_v9 }
 0x5bd   :  { %1263 = vmatprep.subr.mxu1 %v1427_v3 }
 0x5be   :  { %1264 = vmatpush3.msra.mxu1 %v905_v40 }
 0x5bf   :  { %1265 = vmatprep.subr.mxu1 %v1427_v3 }
 0x5c0   :  { %1266 = vmatpush3.msra.mxu1 %v904_v41 }
 0x5c1   :  { %1267 = vmatprep.subr.mxu1 %v1427_v3 }
 0x5c2   :  { %1268 = vmatpush3.msra.mxu1 %v903_v42 }
 0x5c3   :  { %1269 = vmatprep.subr.mxu1 %v1427_v3 }
 0x5c4   :  { %1270 = vmatpush3.msra.mxu1 %v902_v43 }
 0x5c5   :  { %1271 = vmatprep.subr.mxu1 %v1427_v3 }
 0x5c6   :  { %1272 = vmatpush3.msra.mxu1 %v901_v44 }
 0x5c7   :  { %1273 = vmatprep.subr.mxu1 %v1427_v3 }
 0x5c8   :  { %1274 = vmatpush3.msra.mxu1 %v900_v45 }
 0x5c9   :  { %1275 = vmatprep.subr.mxu1 %v1427_v3 }
 0x5ca   :  { %1276 = vmatpush3.msra.mxu1 %v899_v46 }
 0x5cb   :  { %1277 = vmatprep.subr.mxu1 %v1427_v3 }
 0x5cc   :  { %1278 = vmatpush3.msra.mxu1 %v898_v47 }
 0x5cd   :  { %1279 = vmatprep.subr.mxu1 %v1427_v3 }
 0x5ce   :  { %1280 = vmatpush3.msra.mxu1 %v897_v50 }
 0x5cf   :  { %1281 = vmatprep.subr.mxu1 %v1427_v3 }
 0x5d0   :  { %1282 = vmatpush3.msra.mxu1 %v896_v51 }
 0x5d1   :  { %1283 = vmatprep.subr.mxu1 %v1427_v3 }
 0x5d2   :  { %1284 = vmatpush3.msra.mxu1 %v895_v52 }
 0x673   :  { %v797_v48 = vpop.f32.mrf.mxu1 }
 0x674   :  { %1251 = vmatmul.mubr.f32.vlgmr.msra.gmra.mxu0 %v797_v48 }
 0x675   :  { %v1217_v49 = vpop.f32.mrf.mxu1 }
 0x734   :  { %v890_v54 = vpop.f32.mrf.mxu0 }
 0x735   :  { %v891_v55 = vadd.f32 %v1022_v53, %v890_v54 }
 0x736   :  { %v1252_v56 = vpop.f32.mrf.mxu0 }
 0x737   :  { %v894_v57 = vmax.f32 %v891_v55, 0.0 }
 0x739   :  { %1286 = vmatmul.mubr.f32.vlgmr.msra.gmra.mxu1 %v894_v57 }
 0x7f9   :  { %v984_v59 = vpop.f32.mrf.mxu1 }
 0x7fa   :  { %v985_v60 = vadd.f32 %v1023_v58, %v984_v59 }
 0x7fb   :  { %v1287_v3 = vpop.f32.mrf.mxu1 }
 0x7fc   :  { %988 = vst [vmem:[#allocation12] sm:$0xff] %v985_v60 }
 0x7fd   :  { %1401 = shalt.err (!%p1398_p1)
}
 0x7fe   :  { %998 = dma.vmem_to_hbm [thread:$0]  %s996_s22, 128, %s1658_s14, [#allocation4]  }
 0x7ff   :  { %1418 = dma.done.wait [#allocation4], 128  }
 0x800   :  { %1419 = vsyncadd [#allocation4], 4294967168 }
 0x801   :  { %1002 = vsyncpa [#allocation3], 1 }
 0x802   :  { %1003 = vsyncpa [#allocation8], 1 }
 0x803   :  { %1004 = vsyncpa [#allocation11], 1 }
 0x804   :  { %1005 = vsyncpa [#allocation4], 1 }
 0x805   :  { %1006 = vsyncpa [#allocation5], 1 }

</bundles_post_ra>
